<compile_context>
chip_gen: v7x
topology: tpu7x:2x2x1
jax: 0.10.0
libtpu: 0.0.40
codegen_flags: <defaults>
</compile_context>

<pallas_src>
import inspect

import jax
import jax.numpy as jnp
from jax.experimental import pallas as pl
from jax.experimental.pallas import tpu as pltpu


# ---------------------------------------------------------------------------
# Generation detection / tuning knobs
# ---------------------------------------------------------------------------
def _detect_tpu_config():
    try:
        kind = jax.devices()[0].device_kind.lower()
    except Exception:
        kind = ""
    if "v7" in kind:
        # 64 MiB physical VMEM -> leave headroom for Mosaic scratch.
        return dict(tm=256, vmem=48 * 1024 * 1024, x_bf16=False)
    if "v6" in kind:
        return dict(tm=512, vmem=100 * 1024 * 1024, x_bf16=False)
    if "v5" in kind:
        # lowest HBM BW generation: stream x as bf16, upcast in-kernel
        return dict(tm=512, vmem=100 * 1024 * 1024, x_bf16=True)
    return dict(tm=256, vmem=None, x_bf16=False)


def _supports_single_buffering():
    if not hasattr(pl, "Buffered"):
        return False
    try:
        params = inspect.signature(pl.BlockSpec).parameters
    except (TypeError, ValueError):
        return False
    return "pipeline_mode" in params


def _compiler_params(vmem_limit):
    kw = dict(dimension_semantics=("parallel",))
    if vmem_limit is not None:
        kw["vmem_limit_bytes"] = vmem_limit
    return pltpu.CompilerParams(**kw)


# ---------------------------------------------------------------------------
# Kernel 1: one-shot L2 row-normalization of the codebook (done ONCE, bf16 out)
# ---------------------------------------------------------------------------
def _l2norm_rows_kernel(e_ref, o_ref):
    e = e_ref[...]
    inv = jax.lax.rsqrt(jnp.maximum(jnp.sum(e * e, axis=-1, keepdims=True), 1e-12))
    o_ref[...] = (e * inv).astype(o_ref.dtype)


def normalize_codebook(codebook, tk=1024):
    K, C = codebook.shape
    if K < tk or K % tk != 0:
        tk = K
    return pl.pallas_call(
        _l2norm_rows_kernel,
        out_shape=jax.ShapeDtypeStruct((K, C), jnp.bfloat16),
        grid=(K // tk,),
        in_specs=[pl.BlockSpec((tk, C), lambda i: (i, 0))],
        out_specs=pl.BlockSpec((tk, C), lambda i: (i, 0)),
        compiler_params=pltpu.CompilerParams(dimension_semantics=("arbitrary",)),
    )(codebook)


def precompute_codebook(codebook):
    """One-time precompute (cache across forwards when the codebook is frozen)."""
    cb = normalize_codebook(codebook)          # [K, C] bf16, rows unit-norm
    cb_t = jnp.transpose(cb)                   # [C, K] bf16 (avoids per-step vxpose)
    return {"cb": cb, "cb_t": cb_t}


# ---------------------------------------------------------------------------
# Kernel 2: fused per-token VQKD forward (tiled over M = B*N)
# ---------------------------------------------------------------------------
def _vqkd_fused_kernel(
    x_ref,                                # [TM, D3]  (f32 or bf16 stream)
    a_ref, b_ref,                         # folded scaling constants [1, D3]
    tw_ref, tb_ref,                       # teacher stand-in   (bf16 W, f32 b)
    ew_ref, eb_ref,                       # encoder stand-in   (bf16 W, f32 b)
    e1w_ref, e1b_ref, e2w_ref, e2b_ref,   # encode_task layer  (f32, autocast off)
    cbt_ref,                              # normalized codebook, transposed [C, K] bf16
    cb_ref,                               # normalized codebook [K, C] bf16
    dw_ref, db_ref,                       # decoder stand-in   (bf16 W, f32 b)
    d1w_ref, d1b_ref, d2w_ref, d2b_ref,   # decode_task layer  (bf16 W, f32 b)
    idx_ref, commit_ref, cos_ref,         # per-token outputs [TM, 1]
):
    bf = jnp.bfloat16
    x = x_ref[...].astype(jnp.float32)                     # [TM, D3]

    # --- ScalingLayerForBeit2 folded: clip((x+1)*127.5,0,255)/255 -> (.-shift)/scale
    #     == clip(x*A + B, B - A, B + A)  with per-channel A, B.
    a = a_ref[...]
    b = b_ref[...]
    normed = jnp.minimum(jnp.maximum(x * a + b, b - a), b + a)

    # --- teacher stand-in projection (TODO(synk): Pix2StructOpenClipVemb) --------
    target = jnp.dot(normed.astype(bf), tw_ref[...],
                     preferred_element_type=jnp.float32) + tb_ref[...]

    # --- encoder stand-in (TODO(synk): VisionTransformer encoder) ----------------
    enc = jnp.dot(x.astype(bf), ew_ref[...],
                  preferred_element_type=jnp.float32) + eb_ref[...]

    # --- encode_task MLP in f32 (reference uses autocast(enabled=False)) ---------
    h = jnp.tanh(jnp.dot(enc, e1w_ref[...],
                         preferred_element_type=jnp.float32) + e1b_ref[...])
    to_quant = jnp.dot(h, e2w_ref[...],
                       preferred_element_type=jnp.float32) + e2b_ref[...]   # [TM, C]
    C = to_quant.shape[-1]

    # --- NormEMA vector quantization ---------------------------------------------
    zn = to_quant * jax.lax.rsqrt(
        jnp.maximum(jnp.sum(to_quant * to_quant, -1, keepdims=True), 1e-12))
    scores = jnp.dot(zn.astype(bf), cbt_ref[...],
                     preferred_element_type=jnp.float32)                    # [TM, K]
    K = scores.shape[-1]
    mx = jnp.max(scores, axis=-1, keepdims=True)                            # [TM, 1]
    lane = jax.lax.broadcasted_iota(jnp.int32, scores.shape, 1)
    # first index attaining the max (== torch argmin of distances, ties -> first)
    idx = jnp.min(jnp.where(scores >= mx, lane, K), axis=-1, keepdims=True)  # [TM, 1]
    onehot = (lane == idx).astype(bf)                                        # [TM, K]
    zq = jnp.dot(onehot, cb_ref[...], preferred_element_type=jnp.float32)    # [TM, C]

    # commitment term (beta = 1): ||zq - zn||^2 / C == (2 - 2*<zq, zn>)/C
    # because both zq (codebook row) and zn are unit-norm.
    commit = jnp.maximum(2.0 - 2.0 * mx, 0.0) * (1.0 / C)                    # [TM, 1]

    idx_ref[...] = idx
    commit_ref[...] = commit

    # --- decoder stand-in (TODO(synk): VisionTransformer decoder) ----------------
    dec = jnp.dot(zq.astype(bf), dw_ref[...],
                  preferred_element_type=jnp.float32) + db_ref[...]

    # --- decode_task MLP (bf16 weights, f32 accumulation) ------------------------
    g = jnp.tanh(jnp.dot(dec.astype(bf), d1w_ref[...],
                         preferred_element_type=jnp.float32) + d1b_ref[...])
    xrec = jnp.dot(g.astype(bf), d2w_ref[...],
                   preferred_element_type=jnp.float32) + d2b_ref[...]        # [TM, Dout]

    # --- per-token cosine reconstruction term (eps-clamped rsqrt, no NaN) --------
    tn = target * jax.lax.rsqrt(
        jnp.maximum(jnp.sum(target * target, -1, keepdims=True), 1e-12))
    rn = xrec * jax.lax.rsqrt(
        jnp.maximum(jnp.sum(xrec * xrec, -1, keepdims=True), 1e-12))
    cos_ref[...] = 1.0 - jnp.sum(tn * rn, axis=-1, keepdims=True)            # [TM, 1]


# ---------------------------------------------------------------------------
# Parameter init (encoder / decoder / teacher are single-linear stand-ins)
# ---------------------------------------------------------------------------
def init_vqkd_params(key, *, patch_dim, enc_dim, dec_dim, embed_dim, n_embed,
                     decoder_out_dim):
    ks = jax.random.split(key, 10)
    std = 0.02
    return {
        # TODO(synk): full VisionTransformer encoder/decoder not implementable here;
        # deterministic single-linear stand-ins with the correct in/out dims.
        "enc_w": jax.random.normal(ks[0], (patch_dim, enc_dim), jnp.float32) * std,
        "enc_b": jnp.zeros((enc_dim,), jnp.float32),
        "dec_w": jax.random.normal(ks[1], (embed_dim, dec_dim), jnp.float32) * std,
        "dec_b": jnp.zeros((dec_dim,), jnp.float32),
        # TODO(synk): Pix2StructOpenClipVemb teacher has no Pallas equivalent;
        # deterministic projection used to produce a target of the right shape.
        "teacher_w": jax.random.normal(ks[2], (patch_dim, decoder_out_dim),
                                       jnp.float32) * std,
        "teacher_b": jax.random.normal(ks[3], (decoder_out_dim,), jnp.float32) * std,
        # encode_task_layer: Linear -> Tanh -> Linear
        "et_w1": jax.random.normal(ks[4], (enc_dim, enc_dim), jnp.float32) * std,
        "et_b1": jnp.zeros((enc_dim,), jnp.float32),
        "et_w2": jax.random.normal(ks[5], (enc_dim, embed_dim), jnp.float32) * std,
        "et_b2": jnp.zeros((embed_dim,), jnp.float32),
        # decode_task_layer: Linear -> Tanh -> Linear
        "dt_w1": jax.random.normal(ks[6], (dec_dim, dec_dim), jnp.float32) * std,
        "dt_b1": jnp.zeros((dec_dim,), jnp.float32),
        "dt_w2": jax.random.normal(ks[7], (dec_dim, decoder_out_dim),
                                   jnp.float32) * std,
        "dt_b2": jnp.zeros((decoder_out_dim,), jnp.float32),
        # NormEMA codebook (TODO(synk): EMA update / kmeans init are training-time)
        "codebook": jax.random.normal(ks[8], (n_embed, embed_dim), jnp.float32),
    }


# ---------------------------------------------------------------------------
# VQKD forward (mirrors VQKD.forward; forward / eval pass only)
# ---------------------------------------------------------------------------
def vqkd_forward(params, x, position_ids, patch_shapes, seq_lens, pad_mask,
                 patch_size, codebook_consts=None, tm=None):
    # patch_shapes / seq_lens / pad_mask are consumed only by the full ViT / teacher
    # networks in the reference; the stand-ins do not need them (TODO(synk)).
    del patch_shapes, seq_lens, pad_mask

    cfg = _detect_tpu_config()
    if tm is None:
        tm = cfg["tm"]

    B, N, D3 = x.shape
    M = B * N
    Dout = params["teacher_w"].shape[1]
    E = params["enc_w"].shape[1]
    C = params["codebook"].shape[1]
    Dec = params["dec_w"].shape[1]
    K = params["codebook"].shape[0]

    # --- token tiling (TM multiple of 8; pad M up to a multiple of TM) -----------
    TM = tm if M >= tm else max(8, ((M + 7) // 8) * 8)
    Mp = -(-M // TM) * TM
    G = Mp // TM

    stream_dtype = jnp.bfloat16 if cfg["x_bf16"] else jnp.float32
    x_flat = x.reshape(M, D3).astype(stream_dtype)
    if Mp != M:
        x_flat = jnp.pad(x_flat, ((0, Mp - M), (0, 0)))

    # --- folded ScalingLayerForBeit2 constants ------------------------------------
    # normed = clip(x*A + B, B - A, B + A), A = 127.5/(255*scale), B = A - shift/scale
    shift3 = jnp.array([0.48145466, 0.4578275, 0.40821073], jnp.float32)
    scale3 = jnp.array([0.26862954, 0.26130258, 0.27577711], jnp.float32)
    a3 = 1.0 / (scale3 * 255.0)
    c3 = shift3 / scale3
    pp = D3 // 3
    A_vec = jnp.tile(127.5 * a3, pp).reshape(1, D3)
    B_vec = jnp.tile(127.5 * a3 - c3, pp).reshape(1, D3)

    # --- pre-normalized codebook copies (hoistable / cacheable) -------------------
    if codebook_consts is None:
        codebook_consts = precompute_codebook(params["codebook"])
    cb = codebook_consts["cb"]        # [K, C] bf16
    cb_t = codebook_consts["cb_t"]    # [C, K] bf16

    # --- bf16 weights for the MXU-heavy matmuls (encode_task stays f32) ----------
    bf = jnp.bfloat16
    tw = params["teacher_w"].astype(bf)
    ew = params["enc_w"].astype(bf)
    dw = params["dec_w"].astype(bf)
    d1w = params["dt_w1"].astype(bf)
    d2w = params["dt_w2"].astype(bf)

    def row(v):  # bias as [1, dim]
        return v.reshape(1, -1)

    cp = _compiler_params(cfg["vmem"])

    def build_and_run(single_buffer_consts):
        def const(shape):
            if single_buffer_consts:
                return pl.BlockSpec(shape, lambda i: (0, 0),
                                    pipeline_mode=pl.Buffered(1))
            return pl.BlockSpec(shape, lambda i: (0, 0))

        def tok(shape):
            return pl.BlockSpec(shape, lambda i: (i, 0))

        return pl.pallas_call(
            _vqkd_fused_kernel,
            out_shape=(
                jax.ShapeDtypeStruct((Mp, 1), jnp.int32),     # code indices
                jax.ShapeDtypeStruct((Mp, 1), jnp.float32),   # per-token commit
                jax.ShapeDtypeStruct((Mp, 1), jnp.float32),   # per-token (1 - cos)
            ),
            grid=(G,),
            in_specs=[
                tok((TM, D3)),            # x
                const((1, D3)),           # A
                const((1, D3)),           # B
                const((D3, Dout)),        # teacher W (bf16)
                const((1, Dout)),         # teacher b
                const((D3, E)),           # enc W (bf16)
                const((1, E)),            # enc b
                const((E, E)),            # et_w1 (f32)
                const((1, E)),            # et_b1
                const((E, C)),            # et_w2 (f32)
                const((1, C)),            # et_b2
                const((C, K)),            # codebook^T (bf16)
                const((K, C)),            # codebook   (bf16)
                const((C, Dec)),          # dec W (bf16)
                const((1, Dec)),          # dec b
                const((Dec, Dec)),        # dt_w1 (bf16)
                const((1, Dec)),          # dt_b1
                const((Dec, Dout)),       # dt_w2 (bf16)
                const((1, Dout)),         # dt_b2
            ],
            out_specs=(tok((TM, 1)), tok((TM, 1)), tok((TM, 1))),
            compiler_params=cp,
        )(
            x_flat, A_vec, B_vec,
            tw, row(params["teacher_b"]),
            ew, row(params["enc_b"]),
            params["et_w1"], row(params["et_b1"]),
            params["et_w2"], row(params["et_b2"]),
            cb_t, cb,
            dw, row(params["dec_b"]),
            d1w, row(params["dt_b1"]),
            d2w, row(params["dt_b2"]),
        )

    if _supports_single_buffering():
        try:
            idx_col, commit_col, cos_col = build_and_run(True)
        except Exception:
            # Fall back to default double-buffered constants if single buffering
            # is rejected by this Pallas/Mosaic version.
            idx_col, commit_col, cos_col = build_and_run(False)
    else:
        idx_col, commit_col, cos_col = build_and_run(False)

    # --- tiny final reductions in the wrapper (per-token partials -> losses) -----
    embed_ind = idx_col[:M, 0].reshape(B, N)
    commit = commit_col[:M, 0].reshape(B, N)
    cos_term = cos_col[:M, 0].reshape(B, N)

    mask_tok = (position_ids[:, :, 0] != -1).astype(jnp.float32)   # [B, N]
    emb_loss = jnp.sum(commit * mask_tok) / jnp.maximum(jnp.sum(mask_tok), 1.0)
    rec_loss = jnp.mean(
        jnp.sum(cos_term * mask_tok, axis=-1)
        / jnp.maximum(jnp.sum(mask_tok, axis=-1), 1.0))
    loss = emb_loss + rec_loss
    log = {
        "val/quant_loss": emb_loss,
        "val/rec_loss": rec_loss,
        "val/total_loss": loss,
    }
    return loss, log, embed_ind


if __name__ == "__main__":
    key = jax.random.PRNGKey(0)

    # small shapes consistent with the module's forward
    B, N = 2, 8
    patch_size = 4
    patch_dim = 3 * patch_size * patch_size       # 48
    enc_dim, dec_dim = 64, 64
    embed_dim = 32
    n_embed = 512
    decoder_out_dim = 128

    k_x, k_p = jax.random.split(key)
    x = jax.random.uniform(k_x, (B, N, patch_dim), jnp.float32)     # values in [0, 1]

    # positions; mark last 2 tokens of batch 1 as padding
    position_ids = jnp.stack(
        [jnp.tile(jnp.arange(N, dtype=jnp.int32)[None, :], (B, 1)),
         jnp.zeros((B, N), jnp.int32)], axis=-1)                    # [B, N, 2]
    pad = jnp.array([[True] * N, [True] * (N - 2) + [False] * 2])
    position_ids = jnp.where(pad[:, :, None], position_ids, -1)
    pad_mask = pad.astype(jnp.float32)                              # [B, N]
    patch_shapes = jnp.tile(jnp.array([[patch_size, patch_size]], jnp.int32), (B, 1))
    seq_lens = jnp.array([N, N - 2], jnp.int32)

    params = init_vqkd_params(k_p, patch_dim=patch_dim, enc_dim=enc_dim,
                              dec_dim=dec_dim, embed_dim=embed_dim,
                              n_embed=n_embed, decoder_out_dim=decoder_out_dim)

    # codebook normalization hoisted out of the per-step forward (frozen codebook)
    cb_consts = precompute_codebook(params["codebook"])

    loss, log, tokens = vqkd_forward(params, x, position_ids, patch_shapes,
                                     seq_lens, pad_mask, patch_size,
                                     codebook_consts=cb_consts)
    jax.block_until_ready((loss, log, tokens))
    print("KERNEL_OK")
</pallas_src>

<mosaic_0001>
module attributes {stable_mosaic.version = 11 : i64} {
  func.func @_l2norm_rows_kernel(%arg0: i32, %arg1: memref<512x32xf32, #tpu.memory_space<vmem>>, %arg2: memref<512x32xbf16, #tpu.memory_space<vmem>>) attributes {dimension_semantics = [#tpu.dimension_semantics<arbitrary>], iteration_bounds = array<i64: 1>, scalar_prefetch = 0 : i64, scratch_operands = 0 : i64, tpu.core_type = #tpu.core_type<tc>, window_params = [{transform_indices = @transform_0, window_bounds = array<i64: 512, 32>}, {transform_indices = @transform_1, window_bounds = array<i64: 512, 32>}]} {
    %c0 = arith.constant 0 : index
    %c0_0 = arith.constant 0 : index
    %0 = vector.load %arg1[%c0, %c0_0] : memref<512x32xf32, #tpu.memory_space<vmem>>, vector<512x32xf32>
    %1 = arith.mulf %0, %0 : vector<512x32xf32>
    %cst = arith.constant dense<0.000000e+00> : vector<512xf32>
    %2 = vector.multi_reduction <add>, %1, %cst [1] : vector<512x32xf32> to vector<512xf32>
    %3 = vector.shape_cast %2 : vector<512xf32> to vector<512x1xf32>
    %cst_1 = arith.constant 9.99999996E-13 : f32
    %4 = vector.broadcast %cst_1 : f32 to vector<512x1xf32>
    %5 = arith.maximumf %3, %4 : vector<512x1xf32>
    %6 = math.rsqrt %5 : vector<512x1xf32>
    %7 = vector.broadcast %6 : vector<512x1xf32> to vector<512x32xf32>
    %8 = arith.mulf %0, %7 : vector<512x32xf32>
    %9 = arith.truncf %8 : vector<512x32xf32> to vector<512x32xbf16>
    %c0_2 = arith.constant 0 : index
    %c0_3 = arith.constant 0 : index
    %10 = vector.load %arg2[%c0_2, %c0_3] : memref<512x32xbf16, #tpu.memory_space<vmem>>, vector<512x32xbf16>
    tpu.vector_store %arg2[%c0_2, %c0_3], %9 {strides = array<i32>} : memref<512x32xbf16, #tpu.memory_space<vmem>>, vector<512x32xbf16>,
    return
  }
  func.func @transform_0(%arg0: i32) -> (i32, i32) {
    %c0_i32 = arith.constant 0 : i32
    %c0_i32_0 = arith.constant 0 : i32
    return %arg0, %c0_i32 : i32, i32
  }
  func.func @transform_1(%arg0: i32) -> (i32, i32) {
    %c0_i32 = arith.constant 0 : i32
    %c0_i32_0 = arith.constant 0 : i32
    return %arg0, %c0_i32 : i32, i32
  }
}

</mosaic_0001>

<bundles_post_ra>
// kernel: tpu_custom_call.1
= control target key start
LH: loop header
LB: loop body
LE: loop exit
PB: predicated region body
PF: predicated region fallthrough
CT: control target
= control target key end

     0   :  { %vm136_vm0 = vcmask 261120   ;;  %vm777_vm1 = vcmask 257024   ;;  %s1944_s0 = inlined_call_operand.vmem [shape: f32[512,32], index: 0, kind: input, shape index: {}]   ;;  %s1945_s1 = inlined_call_operand.vmem [shape: bf16[512,32], index: 1, kind: output, shape index: {}]  }
   0x1   :  { %v1115_v0 = vld [vmem:[%s1944_s0 + $0x10] sm:$0xff]  ;;  %v1120_v1 = vld [vmem:[%s1944_s0] sm:$0xff]  ;;  %v1125_v2 = vld [vmem:[%s1944_s0 + $0x18] sm:$0xff] }
   0x2   :  { %v74_v3 = vmul.f32 %v1115_v0, %v1115_v0  ;;  %v72_v4 = vmul.f32 %v1120_v1, %v1120_v1  ;;  %v75_v5 = vmul.f32 %v1125_v2, %v1125_v2  ;;  %v1136_v6 = vld [vmem:[%s1944_s0 + $0x8] sm:$0xff]  ;;  %v1148_v9 = vld [vmem:[%s1944_s0 + $0x20] sm:$0xff]  ;;  %v1161_v16 = vld [vmem:[%s1944_s0 + $0x38] sm:$0xff] }
   0x3   :  { %v73_v7 = vmul.f32 %v1136_v6, %v1136_v6  ;;  %v1143_v8 = vld [vmem:[%s1944_s0 + $0x28] sm:$0xff]  ;;  %v76_v15 = vmul.f32 %v1148_v9, %v1148_v9  ;;  %v1166_v17 = vld [vmem:[%s1944_s0 + $0x30] sm:$0xff]  ;;  %v79_v20 = vmul.f32 %v1161_v16, %v1161_v16  ;;  %v1182_v23 = vld [vmem:[%s1944_s0 + $0x40] sm:$0xff] }
   0x4   :  { %v143_v10 = vsel %vm136_vm0, %v74_v3, 0.0  ;;  %v137_v11 = vsel %vm136_vm0, %v72_v4, 0.0  ;;  %v146_v12 = vsel %vm136_vm0, %v75_v5, 0.0  ;;  %v77_v14 = vmul.f32 %v1143_v8, %v1143_v8  ;;  %v1177_v22 = vld [vmem:[%s1944_s0 + $0x48] sm:$0xff]  ;;  %v1193_v28 = vld [vmem:[%s1944_s0 + $0x58] sm:$0xff]  ;;  %v1198_v29 = vld [vmem:[%s1944_s0 + $0x50] sm:$0xff] }
   0x5   :  { %144 = vadd.xlane.f32.xlu1 %v143_v10  ;;  %138 = vadd.xlane.f32.xlu0 %v137_v11  ;;  %v140_v13 = vsel %vm136_vm0, %v73_v7, 0.0  ;;  %v149_v19 = vsel %vm136_vm0, %v76_v15, 0.0  ;;  %v78_v21 = vmul.f32 %v1166_v17, %v1166_v17  ;;  %v158_v24 = vsel %vm136_vm0, %v79_v20, 0.0  ;;  %v1209_v34 = vld [vmem:[%s1944_s0 + $0x68] sm:$0xff]  ;;  %v1214_v35 = vld [vmem:[%s1944_s0 + $0x60] sm:$0xff]  ;;  %v1225_v40 = vld [vmem:[%s1944_s0 + $0x78] sm:$0xff] }
   0x6   :  { %v152_v18 = vsel %vm136_vm0, %v77_v14, 0.0  ;;  %v81_v26 = vmul.f32 %v1177_v22, %v1177_v22  ;;  %v80_v27 = vmul.f32 %v1182_v23, %v1182_v23  ;;  %v83_v32 = vmul.f32 %v1193_v28, %v1193_v28  ;;  %v1230_v41 = vld [vmem:[%s1944_s0 + $0x70] sm:$0xff]  ;;  %v1241_v46 = vld [vmem:[%s1944_s0 + $0x88] sm:$0xff]  ;;  %v1246_v47 = vld [vmem:[%s1944_s0 + $0x80] sm:$0xff] }
   0x7   :  { %v155_v25 = vsel %vm136_vm0, %v78_v21, 0.0  ;;  %v82_v33 = vmul.f32 %v1198_v29, %v1198_v29  ;;  %v85_v38 = vmul.f32 %v1209_v34, %v1209_v34  ;;  %v84_v39 = vmul.f32 %v1214_v35, %v1214_v35  ;;  %v1257_v52 = vld [vmem:[%s1944_s0 + $0x98] sm:$0xff]  ;;  %v1262_v53 = vld [vmem:[%s1944_s0 + $0x90] sm:$0xff]  ;;  %v1273_v58 = vld [vmem:[%s1944_s0 + $0xa8] sm:$0xff] }
   0x8   :  { %v164_v30 = vsel %vm136_vm0, %v81_v26, 0.0  ;;  %v161_v31 = vsel %vm136_vm0, %v80_v27, 0.0  ;;  %v170_v36 = vsel %vm136_vm0, %v83_v32, 0.0  ;;  %v87_v44 = vmul.f32 %v1225_v40, %v1225_v40  ;;  %v1278_v59 = vld [vmem:[%s1944_s0 + $0xa0] sm:$0xff]  ;;  %v1289_v3 = vld [vmem:[%s1944_s0 + $0xb8] sm:$0xff]  ;;  %v1294_v4 = vld [vmem:[%s1944_s0 + $0xb0] sm:$0xff] }
   0x9   :  { %147 = vadd.xlane.f32.xlu1 %v146_v12  ;;  %141 = vadd.xlane.f32.xlu0 %v140_v13  ;;  %v167_v37 = vsel %vm136_vm0, %v82_v33, 0.0  ;;  %v176_v42 = vsel %vm136_vm0, %v85_v38, 0.0  ;;  %v173_v43 = vsel %vm136_vm0, %v84_v39, 0.0  ;;  %v86_v45 = vmul.f32 %v1230_v41, %v1230_v41  ;;  %v1305_v12 = vld [vmem:[%s1944_s0 + $0xc8] sm:$0xff]  ;;  %v1310_v13 = vld [vmem:[%s1944_s0 + $0xc0] sm:$0xff]  ;;  %v1321_v20 = vld [vmem:[%s1944_s0 + $0xd8] sm:$0xff] }
   0xa   :  { %v182_v48 = vsel %vm136_vm0, %v87_v44, 0.0  ;;  %v89_v50 = vmul.f32 %v1241_v46, %v1241_v46  ;;  %v88_v51 = vmul.f32 %v1246_v47, %v1246_v47  ;;  %v91_v56 = vmul.f32 %v1257_v52, %v1257_v52  ;;  %v1326_v21 = vld [vmem:[%s1944_s0 + $0xd0] sm:$0xff]  ;;  %v1353_v38 = vld [vmem:[%s1944_s0 + $0xf8] sm:$0xff] }
   0xb   :  { %v179_v49 = vsel %vm136_vm0, %v86_v45, 0.0  ;;  %v90_v57 = vmul.f32 %v1262_v53, %v1262_v53  ;;  %v93_v62 = vmul.f32 %v1273_v58, %v1273_v58  ;;  %v92_v63 = vmul.f32 %v1278_v59, %v1278_v59  ;;  %v1358_v39 = vld [vmem:[%s1944_s0 + $0xf0] sm:$0xff] }
   0xc   :  { %v188_v54 = vsel %vm136_vm0, %v89_v50, 0.0  ;;  %v185_v55 = vsel %vm136_vm0, %v88_v51, 0.0  ;;  %v194_v60 = vsel %vm136_vm0, %v91_v56, 0.0  ;;  %v95_v10 = vmul.f32 %v1289_v3, %v1289_v3  ;;  %v1385_v56 = vld [vmem:[%s1944_s0 + $0x118] sm:$0xff] }
   0xd   :  { %153 = vadd.xlane.f32.xlu1 %v152_v18  ;;  %150 = vadd.xlane.f32.xlu0 %v149_v19  ;;  %v191_v61 = vsel %vm136_vm0, %v90_v57, 0.0  ;;  %v200_v5 = vsel %vm136_vm0, %v93_v62, 0.0  ;;  %v197_v7 = vsel %vm136_vm0, %v92_v63, 0.0  ;;  %v94_v11 = vmul.f32 %v1294_v4, %v1294_v4  ;;  %v1390_v57 = vld [vmem:[%s1944_s0 + $0x110] sm:$0xff] }
   0xe   :  { %v206_v14 = vsel %vm136_vm0, %v95_v10, 0.0  ;;  %v97_v18 = vmul.f32 %v1305_v12, %v1305_v12  ;;  %v96_v19 = vmul.f32 %v1310_v13, %v1310_v13  ;;  %v99_v26 = vmul.f32 %v1321_v20, %v1321_v20 }
   0xf   :  { %v203_v15 = vsel %vm136_vm0, %v94_v11, 0.0  ;;  %v98_v27 = vmul.f32 %v1326_v21, %v1326_v21  ;;  %v103_v44 = vmul.f32 %v1353_v38, %v1353_v38  ;;  %v102_v45 = vmul.f32 %v1358_v39, %v1358_v39 }
  0x10   :  { %v218_v32 = vsel %vm136_vm0, %v99_v26, 0.0  ;;  %v107_v62 = vmul.f32 %v1385_v56, %v1385_v56  ;;  %v106_v63 = vmul.f32 %v1390_v57, %v1390_v57 }
  0x11   :  { %159 = vadd.xlane.f32.xlu1 %v158_v24  ;;  %156 = vadd.xlane.f32.xlu0 %v155_v25  ;;  %v212_v24 = vsel %vm136_vm0, %v97_v18, 0.0  ;;  %v209_v25 = vsel %vm136_vm0, %v96_v19, 0.0  ;;  %v215_v33 = vsel %vm136_vm0, %v98_v27, 0.0  ;;  %v230_v50 = vsel %vm136_vm0, %v103_v44, 0.0  ;;  %v1417_v18 = vld [vmem:[%s1944_s0 + $0x138] sm:$0xff]  ;;  %v1422_v19 = vld [vmem:[%s1944_s0 + $0x130] sm:$0xff] }
  0x12   :  { %v227_v51 = vsel %vm136_vm0, %v102_v45, 0.0  ;;  %v242_v10 = vsel %vm136_vm0, %v107_v62, 0.0  ;;  %v239_v11 = vsel %vm136_vm0, %v106_v63, 0.0  ;;  %v111_v26 = vmul.f32 %v1417_v18, %v1417_v18  ;;  %v1449_v44 = vld [vmem:[%s1944_s0 + $0x158] sm:$0xff]  ;;  %v1454_v45 = vld [vmem:[%s1944_s0 + $0x150] sm:$0xff] }
  0x13   :  { %v110_v27 = vmul.f32 %v1422_v19, %v1422_v19 }
  0x15   :  { %165 = vadd.xlane.f32.xlu1 %v164_v30  ;;  %162 = vadd.xlane.f32.xlu0 %v161_v31  ;;  %v1337_v30 = vld [vmem:[%s1944_s0 + $0xe8] sm:$0xff]  ;;  %v1342_v31 = vld [vmem:[%s1944_s0 + $0xe0] sm:$0xff] }
  0x19   :  { %171 = vadd.xlane.f32.xlu1 %v170_v36  ;;  %168 = vadd.xlane.f32.xlu0 %v167_v37  ;;  %v101_v36 = vmul.f32 %v1337_v30, %v1337_v30  ;;  %v100_v37 = vmul.f32 %v1342_v31, %v1342_v31 }
  0x1d   :  { %177 = vadd.xlane.f32.xlu1 %v176_v42  ;;  %174 = vadd.xlane.f32.xlu0 %v173_v43  ;;  %v224_v42 = vsel %vm136_vm0, %v101_v36, 0.0  ;;  %v221_v43 = vsel %vm136_vm0, %v100_v37, 0.0  ;;  %v254_v36 = vsel %vm136_vm0, %v111_v26, 0.0  ;;  %v251_v37 = vsel %vm136_vm0, %v110_v27, 0.0 }
  0x21   :  { %183 = vadd.xlane.f32.xlu1 %v182_v48  ;;  %180 = vadd.xlane.f32.xlu0 %v179_v49  ;;  %v1369_v48 = vld [vmem:[%s1944_s0 + $0x108] sm:$0xff]  ;;  %v1374_v49 = vld [vmem:[%s1944_s0 + $0x100] sm:$0xff] }
  0x25   :  { %189 = vadd.xlane.f32.xlu1 %v188_v54  ;;  %186 = vadd.xlane.f32.xlu0 %v185_v55  ;;  %v105_v54 = vmul.f32 %v1369_v48, %v1369_v48  ;;  %v104_v55 = vmul.f32 %v1374_v49, %v1374_v49 }
  0x29   :  { %195 = vadd.xlane.f32.xlu1 %v194_v60  ;;  %192 = vadd.xlane.f32.xlu0 %v191_v61  ;;  %v236_v60 = vsel %vm136_vm0, %v105_v54, 0.0  ;;  %v233_v61 = vsel %vm136_vm0, %v104_v55, 0.0  ;;  %v115_v54 = vmul.f32 %v1449_v44, %v1449_v44  ;;  %v114_v55 = vmul.f32 %v1454_v45, %v1454_v45 }
  0x2b   :  { %v266_v62 = vsel %vm136_vm0, %v115_v54, 0.0  ;;  %v263_v63 = vsel %vm136_vm0, %v114_v55, 0.0  ;;  %v1513_v54 = vld [vmem:[%s1944_s0 + $0x198] sm:$0xff]  ;;  %v1518_v55 = vld [vmem:[%s1944_s0 + $0x190] sm:$0xff] }
  0x2c   :  { %1964 = vst [vmem:[#allocation4_spill] sm:$0xff] %v1513_v54  ;;  %1965 = vst [vmem:[#allocation5_spill] sm:$0xff] %v1518_v55 }
  0x2d   :  { %201 = vadd.xlane.f32.xlu1 %v200_v5  ;;  %198 = vadd.xlane.f32.xlu0 %v197_v7  ;;  %v1401_v5 = vld [vmem:[%s1944_s0 + $0x128] sm:$0xff]  ;;  %v1406_v7 = vld [vmem:[%s1944_s0 + $0x120] sm:$0xff] }
  0x31   :  { %207 = vadd.xlane.f32.xlu1 %v206_v14  ;;  %204 = vadd.xlane.f32.xlu0 %v203_v15  ;;  %v109_v14 = vmul.f32 %v1401_v5, %v1401_v5  ;;  %v108_v15 = vmul.f32 %v1406_v7, %v1406_v7 }
  0x35   :  { %213 = vadd.xlane.f32.xlu1 %v212_v24  ;;  %210 = vadd.xlane.f32.xlu0 %v209_v25  ;;  %v248_v24 = vsel %vm136_vm0, %v109_v14, 0.0  ;;  %v245_v25 = vsel %vm136_vm0, %v108_v15, 0.0  ;;  %v1481_v14 = vld [vmem:[%s1944_s0 + $0x178] sm:$0xff]  ;;  %v1486_v15 = vld [vmem:[%s1944_s0 + $0x170] sm:$0xff] }
  0x36   :  { %v119_v26 = vmul.f32 %v1481_v14, %v1481_v14  ;;  %v118_v27 = vmul.f32 %v1486_v15, %v1486_v15 }
  0x39   :  { %219 = vadd.xlane.f32.xlu1 %v218_v32  ;;  %216 = vadd.xlane.f32.xlu0 %v215_v33  ;;  %v1433_v32 = vld [vmem:[%s1944_s0 + $0x148] sm:$0xff]  ;;  %v1438_v33 = vld [vmem:[%s1944_s0 + $0x140] sm:$0xff] }
  0x3d   :  { %225 = vadd.xlane.f32.xlu1 %v224_v42  ;;  %222 = vadd.xlane.f32.xlu0 %v221_v43  ;;  %v113_v42 = vmul.f32 %v1433_v32, %v1433_v32  ;;  %v112_v43 = vmul.f32 %v1438_v33, %v1438_v33 }
  0x41   :  { %231 = vadd.xlane.f32.xlu1 %v230_v50  ;;  %228 = vadd.xlane.f32.xlu0 %v227_v51  ;;  %v260_v50 = vsel %vm136_vm0, %v113_v42, 0.0  ;;  %v257_v51 = vsel %vm136_vm0, %v112_v43, 0.0  ;;  %v278_v42 = vsel %vm136_vm0, %v119_v26, 0.0  ;;  %v275_v43 = vsel %vm136_vm0, %v118_v27, 0.0 }
  0x45   :  { %237 = vadd.xlane.f32.xlu1 %v236_v60  ;;  %234 = vadd.xlane.f32.xlu0 %v233_v61  ;;  %v1465_v60 = vld [vmem:[%s1944_s0 + $0x168] sm:$0xff]  ;;  %v1470_v61 = vld [vmem:[%s1944_s0 + $0x160] sm:$0xff] }
  0x49   :  { %243 = vadd.xlane.f32.xlu1 %v242_v10  ;;  %240 = vadd.xlane.f32.xlu0 %v239_v11  ;;  %v117_v10 = vmul.f32 %v1465_v60, %v1465_v60  ;;  %v116_v11 = vmul.f32 %v1470_v61, %v1470_v61 }
  0x4d   :  { %249 = vadd.xlane.f32.xlu1 %v248_v24  ;;  %246 = vadd.xlane.f32.xlu0 %v245_v25  ;;  %v272_v24 = vsel %vm136_vm0, %v117_v10, 0.0  ;;  %v269_v25 = vsel %vm136_vm0, %v116_v11, 0.0  ;;  %v123_v10 = vmul.f32 %v1513_v54, %v1513_v54  ;;  %v122_v11 = vmul.f32 %v1518_v55, %v1518_v55 }
  0x4f   :  { %v290_v26 = vsel %vm136_vm0, %v123_v10, 0.0  ;;  %v287_v27 = vsel %vm136_vm0, %v122_v11, 0.0 }
  0x51   :  { %255 = vadd.xlane.f32.xlu1 %v254_v36  ;;  %252 = vadd.xlane.f32.xlu0 %v251_v37  ;;  %v1497_v36 = vld [vmem:[%s1944_s0 + $0x188] sm:$0xff]  ;;  %v1502_v37 = vld [vmem:[%s1944_s0 + $0x180] sm:$0xff] }
  0x52   :  { %1962 = vst [vmem:[#allocation2_spill] sm:$0xff] %v1497_v36  ;;  %1963 = vst [vmem:[#allocation3_spill] sm:$0xff] %v1502_v37 }
  0x55   :  { %261 = vadd.xlane.f32.xlu1 %v260_v50  ;;  %258 = vadd.xlane.f32.xlu0 %v257_v51  ;;  %v121_v50 = vmul.f32 %v1497_v36, %v1497_v36  ;;  %v120_v51 = vmul.f32 %v1502_v37, %v1502_v37 }
  0x59   :  { %267 = vadd.xlane.f32.xlu1 %v266_v62  ;;  %264 = vadd.xlane.f32.xlu0 %v263_v63  ;;  %v284_v62 = vsel %vm136_vm0, %v121_v50, 0.0  ;;  %v281_v63 = vsel %vm136_vm0, %v120_v51, 0.0  ;;  %v1545_v50 = vld [vmem:[%s1944_s0 + $0x1b8] sm:$0xff]  ;;  %v1550_v51 = vld [vmem:[%s1944_s0 + $0x1b0] sm:$0xff] }
  0x5a   :  { %1968 = vst [vmem:[#allocation8_spill] sm:$0xff] %v1545_v50  ;;  %1969 = vst [vmem:[#allocation9_spill] sm:$0xff] %v1550_v51  ;;  %v127_v10 = vmul.f32 %v1545_v50, %v1545_v50  ;;  %v126_v11 = vmul.f32 %v1550_v51, %v1550_v51  ;;  %v1577_v50 = vld [vmem:[%s1944_s0 + $0x1d8] sm:$0xff] }
  0x5b   :  { %1972 = vst [vmem:[#allocation12_spill] sm:$0xff] %v1577_v50 }
  0x5d   :  { %273 = vadd.xlane.f32.xlu1 %v272_v24  ;;  %270 = vadd.xlane.f32.xlu0 %v269_v25  ;;  %v1529_v24 = vld [vmem:[%s1944_s0 + $0x1a8] sm:$0xff]  ;;  %v1534_v25 = vld [vmem:[%s1944_s0 + $0x1a0] sm:$0xff] }
  0x5e   :  { %1966 = vst [vmem:[#allocation6_spill] sm:$0xff] %v1529_v24  ;;  %1967 = vst [vmem:[#allocation7_spill] sm:$0xff] %v1534_v25 }
  0x61   :  { %279 = vadd.xlane.f32.xlu1 %v278_v42  ;;  %276 = vadd.xlane.f32.xlu0 %v275_v43  ;;  %v125_v42 = vmul.f32 %v1529_v24, %v1529_v24  ;;  %v124_v43 = vmul.f32 %v1534_v25, %v1534_v25  ;;  %v1561_v25 = vld [vmem:[%s1944_s0 + $0x1c8] sm:$0xff] }
  0x62   :  { %1970 = vst [vmem:[#allocation10_spill] sm:$0xff] %v1561_v25 }
  0x65   :  { %285 = vadd.xlane.f32.xlu1 %v284_v62  ;;  %282 = vadd.xlane.f32.xlu0 %v281_v63  ;;  %v296_v62 = vsel %vm136_vm0, %v125_v42, 0.0  ;;  %v293_v63 = vsel %vm136_vm0, %v124_v43, 0.0  ;;  %v299_v42 = vsel %vm136_vm0, %v126_v11, 0.0  ;;  %v129_v43 = vmul.f32 %v1561_v25, %v1561_v25  ;;  %v1593_v25 = vld [vmem:[%s1944_s0 + $0x1e8] sm:$0xff] }
  0x66   :  { %v131_v11 = vmul.f32 %v1577_v50, %v1577_v50  ;;  %1974 = vst [vmem:[#allocation14_spill] sm:$0xff] %v1593_v25  ;;  %v1609_v50 = vld [vmem:[%s1944_s0 + $0x1f8] sm:$0xff] }
  0x67   :  { %1976 = vst [vmem:[#allocation16_spill] sm:$0xff] %v1609_v50 }
  0x69   :  { %291 = vadd.xlane.f32.xlu1 %v290_v26  ;;  %288 = vadd.xlane.f32.xlu0 %v287_v27  ;;  %v1566_v26 = vld [vmem:[%s1944_s0 + $0x1c0] sm:$0xff]  ;;  %v302_v27 = vsel %vm136_vm0, %v127_v10, 0.0 }
  0x6a   :  { %1971 = vst [vmem:[#allocation11_spill] sm:$0xff] %v1566_v26  ;;  %v128_v51 = vmul.f32 %v1566_v26, %v1566_v26 }
  0x6c   :  { %v305_v10 = vsel %vm136_vm0, %v128_v51, 0.0  ;;  %v314_v51 = vsel %vm136_vm0, %v131_v11, 0.0  ;;  %v135_v11 = vmul.f32 %v1609_v50, %v1609_v50 }
  0x6d   :  { %297 = vadd.xlane.f32.xlu1 %v296_v62  ;;  %294 = vadd.xlane.f32.xlu0 %v293_v63  ;;  %v1582_v62 = vld [vmem:[%s1944_s0 + $0x1d0] sm:$0xff]  ;;  %v308_v63 = vsel %vm136_vm0, %v129_v43, 0.0  ;;  %v133_v43 = vmul.f32 %v1593_v25, %v1593_v25 }
  0x6e   :  { %1973 = vst [vmem:[#allocation13_spill] sm:$0xff] %v1582_v62  ;;  %v130_v26 = vmul.f32 %v1582_v62, %v1582_v62  ;;  %v326_v25 = vsel %vm136_vm0, %v135_v11, 0.0 }
  0x71   :  { %303 = vadd.xlane.f32.xlu1 %v302_v27  ;;  %300 = vadd.xlane.f32.xlu0 %v299_v42  ;;  %v1598_v27 = vld [vmem:[%s1944_s0 + $0x1e0] sm:$0xff]  ;;  %v311_v42 = vsel %vm136_vm0, %v130_v26, 0.0  ;;  %v320_v26 = vsel %vm136_vm0, %v133_v43, 0.0 }
  0x72   :  { %1975 = vst [vmem:[#allocation15_spill] sm:$0xff] %v1598_v27  ;;  %v132_v62 = vmul.f32 %v1598_v27, %v1598_v27 }
  0x75   :  { %309 = vadd.xlane.f32.xlu1 %v308_v63  ;;  %306 = vadd.xlane.f32.xlu0 %v305_v10  ;;  %v1614_v63 = vld [vmem:[%s1944_s0 + $0x1f0] sm:$0xff]  ;;  %v317_v10 = vsel %vm136_vm0, %v132_v62, 0.0 }
  0x76   :  { %1977 = vst [vmem:[#allocation17_spill] sm:$0xff] %v1614_v63  ;;  %v134_v27 = vmul.f32 %v1614_v63, %v1614_v63 }
  0x78   :  { %v323_v24 = vsel %vm136_vm0, %v134_v27, 0.0 }
  0x79   :  { %315 = vadd.xlane.f32.xlu1 %v314_v51  ;;  %312 = vadd.xlane.f32.xlu0 %v311_v42 }
  0x7d   :  { %321 = vadd.xlane.f32.xlu1 %v320_v26  ;;  %318 = vadd.xlane.f32.xlu0 %v317_v10 }
  0x81   :  { %327 = vadd.xlane.f32.xlu1 %v326_v25  ;;  %324 = vadd.xlane.f32.xlu0 %v323_v24 }
  0x92   :  { %v145_v51 = vpop.xlane.xlu1 %144  ;;  %v139_v42 = vpop.xlane.xlu0 %138 }
  0x93   :  { %v331_v55 = vmax.f32 %v145_v51, 1e-12  ;;  %v329_v43 = vmax.f32 %v139_v42, 1e-12 }
  0x95   :  { %974 = vrsqrt.f32 %v331_v55 }
  0x96   :  { %976 = vrsqrt.f32 %v329_v43  ;;  %v148_v62 = vpop.xlane.xlu1 %147  ;;  %v142_v54 = vpop.xlane.xlu0 %141 }
  0x97   :  { %v332_v50 = vmax.f32 %v148_v62, 1e-12  ;;  %v330_v37 = vmax.f32 %v142_v54, 1e-12 }
  0x99   :  { %978 = vrsqrt.f32 %v332_v50 }
  0x9a   :  { %980 = vrsqrt.f32 %v330_v37  ;;  %v154_v26 = vpop.xlane.xlu1 %153  ;;  %v151_v10 = vpop.xlane.xlu0 %150 }
  0x9b   :  { %v334_v63 = vmax.f32 %v154_v26, 1e-12  ;;  %v333_v11 = vmax.f32 %v151_v10, 1e-12 }
  0x9d   :  { %982 = vrsqrt.f32 %v334_v63 }
  0x9e   :  { %984 = vrsqrt.f32 %v333_v11  ;;  %v160_v25 = vpop.xlane.xlu1 %159  ;;  %v157_v24 = vpop.xlane.xlu0 %156 }
  0x9f   :  { %v975_v27 = vpop.eup %974  ;;  %v336_v36 = vmax.f32 %v160_v25, 1e-12  ;;  %v335_v51 = vmax.f32 %v157_v24, 1e-12 }
  0xa0   :  { %v977_v42 = vpop.eup %976  ;;  %v459_v55 = vmul.f32 %v975_v27, %v1115_v0 }
  0xa1   :  { %v457_v43 = vmul.f32 %v977_v42, %v1120_v1  ;;  %986 = vrsqrt.f32 %v336_v36 }
  0xa2   :  { %v912_v54 = vpack.c.bf16 %v459_v55, %v459_v55  ;;  %988 = vrsqrt.f32 %v335_v51  ;;  %v166_v37 = vpop.xlane.xlu1 %165  ;;  %v163_v50 = vpop.xlane.xlu0 %162 }
  0xa3   :  { %v979_v62 = vpop.eup %978  ;;  %v910_v26 = vpack.c.bf16 %v457_v43, %v457_v43  ;;  %v338_v63 = vmax.f32 %v166_v37, 1e-12  ;;  %v337_v10 = vmax.f32 %v163_v50, 1e-12 }
  0xa4   :  { %v981_v11 = vpop.eup %980  ;;  %780 = vst.msk [vmem:[%s1945_s1 + $0x8] sm:$0xf] %vm777_vm1, %v912_v54  ;;  %v460_v0 = vmul.f32 %v979_v62, %v1125_v2 }
  0xa5   :  { %778 = vst.msk [vmem:[%s1945_s1] sm:$0xf] %vm777_vm1, %v910_v26  ;;  %v458_v1 = vmul.f32 %v981_v11, %v1136_v6  ;;  %990 = vrsqrt.f32 %v338_v63 }
  0xa6   :  { %v913_v36 = vpack.c.bf16 %v460_v0, %v460_v0  ;;  %992 = vrsqrt.f32 %v337_v10  ;;  %v172_v25 = vpop.xlane.xlu1 %171  ;;  %v169_v24 = vpop.xlane.xlu0 %168 }
  0xa7   :  { %v983_v27 = vpop.eup %982  ;;  %v911_v51 = vpack.c.bf16 %v458_v1, %v458_v1  ;;  %v340_v42 = vmax.f32 %v172_v25, 1e-12  ;;  %v339_v55 = vmax.f32 %v169_v24, 1e-12 }
  0xa8   :  { %v985_v43 = vpop.eup %984  ;;  %781 = vst.msk [vmem:[%s1945_s1 + $0xc] sm:$0xf] %vm777_vm1, %v913_v36  ;;  %v462_v2 = vmul.f32 %v983_v27, %v1143_v8 }
  0xa9   :  { %779 = vst.msk [vmem:[%s1945_s1 + $0x4] sm:$0xf] %vm777_vm1, %v911_v51  ;;  %v461_v6 = vmul.f32 %v985_v43, %v1148_v9  ;;  %994 = vrsqrt.f32 %v340_v42 }
  0xaa   :  { %v915_v54 = vpack.c.bf16 %v462_v2, %v462_v2  ;;  %996 = vrsqrt.f32 %v339_v55  ;;  %v178_v37 = vpop.xlane.xlu1 %177  ;;  %v175_v50 = vpop.xlane.xlu0 %174 }
  0xab   :  { %v987_v62 = vpop.eup %986  ;;  %v914_v26 = vpack.c.bf16 %v461_v6, %v461_v6  ;;  %v342_v63 = vmax.f32 %v178_v37, 1e-12  ;;  %v341_v10 = vmax.f32 %v175_v50, 1e-12 }
  0xac   :  { %v989_v11 = vpop.eup %988  ;;  %783 = vst.msk [vmem:[%s1945_s1 + $0x14] sm:$0xf] %vm777_vm1, %v915_v54  ;;  %v464_v8 = vmul.f32 %v987_v62, %v1161_v16 }
  0xad   :  { %782 = vst.msk [vmem:[%s1945_s1 + $0x10] sm:$0xf] %vm777_vm1, %v914_v26  ;;  %v463_v9 = vmul.f32 %v989_v11, %v1166_v17  ;;  %998 = vrsqrt.f32 %v342_v63 }
  0xae   :  { %v917_v0 = vpack.c.bf16 %v464_v8, %v464_v8  ;;  %1000 = vrsqrt.f32 %v341_v10  ;;  %v184_v1 = vpop.xlane.xlu1 %183  ;;  %v181_v36 = vpop.xlane.xlu0 %180 }
  0xaf   :  { %v991_v25 = vpop.eup %990  ;;  %v916_v24 = vpack.c.bf16 %v463_v9, %v463_v9  ;;  %v344_v27 = vmax.f32 %v184_v1, 1e-12  ;;  %v343_v51 = vmax.f32 %v181_v36, 1e-12 }
  0xb0   :  { %v993_v42 = vpop.eup %992  ;;  %785 = vst.msk [vmem:[%s1945_s1 + $0x1c] sm:$0xf] %vm777_vm1, %v917_v0  ;;  %v466_v16 = vmul.f32 %v991_v25, %v1177_v22 }
  0xb1   :  { %784 = vst.msk [vmem:[%s1945_s1 + $0x18] sm:$0xf] %vm777_vm1, %v916_v24  ;;  %v465_v17 = vmul.f32 %v993_v42, %v1182_v23  ;;  %1002 = vrsqrt.f32 %v344_v27 }
  0xb2   :  { %v919_v55 = vpack.c.bf16 %v466_v16, %v466_v16  ;;  %1004 = vrsqrt.f32 %v343_v51  ;;  %v190_v43 = vpop.xlane.xlu1 %189  ;;  %v187_v2 = vpop.xlane.xlu0 %186 }
  0xb3   :  { %v995_v6 = vpop.eup %994  ;;  %v918_v54 = vpack.c.bf16 %v465_v17, %v465_v17  ;;  %v346_v37 = vmax.f32 %v190_v43, 1e-12  ;;  %v345_v50 = vmax.f32 %v187_v2, 1e-12 }
  0xb4   :  { %v997_v62 = vpop.eup %996  ;;  %787 = vst.msk [vmem:[%s1945_s1 + $0x24] sm:$0xf] %vm777_vm1, %v919_v55  ;;  %v468_v22 = vmul.f32 %v995_v6, %v1193_v28 }
  0xb5   :  { %786 = vst.msk [vmem:[%s1945_s1 + $0x20] sm:$0xf] %vm777_vm1, %v918_v54  ;;  %v467_v23 = vmul.f32 %v997_v62, %v1198_v29  ;;  %1006 = vrsqrt.f32 %v346_v37 }
  0xb6   :  { %v921_v26 = vpack.c.bf16 %v468_v22, %v468_v22  ;;  %1008 = vrsqrt.f32 %v345_v50  ;;  %v196_v63 = vpop.xlane.xlu1 %195  ;;  %v193_v10 = vpop.xlane.xlu0 %192 }
  0xb7   :  { %v999_v11 = vpop.eup %998  ;;  %v920_v8 = vpack.c.bf16 %v467_v23, %v467_v23  ;;  %v348_v9 = vmax.f32 %v196_v63, 1e-12  ;;  %v347_v0 = vmax.f32 %v193_v10, 1e-12 }
  0xb8   :  { %v1001_v1 = vpop.eup %1000  ;;  %789 = vst.msk [vmem:[%s1945_s1 + $0x2c] sm:$0xf] %vm777_vm1, %v921_v26  ;;  %v470_v28 = vmul.f32 %v999_v11, %v1209_v34 }
  0xb9   :  { %788 = vst.msk [vmem:[%s1945_s1 + $0x28] sm:$0xf] %vm777_vm1, %v920_v8  ;;  %v469_v29 = vmul.f32 %v1001_v1, %v1214_v35  ;;  %1010 = vrsqrt.f32 %v348_v9 }
  0xba   :  { %v923_v36 = vpack.c.bf16 %v470_v28, %v470_v28  ;;  %1012 = vrsqrt.f32 %v347_v0  ;;  %v202_v25 = vpop.xlane.xlu1 %201  ;;  %v199_v24 = vpop.xlane.xlu0 %198 }
  0xbb   :  { %v1003_v27 = vpop.eup %1002  ;;  %v922_v51 = vpack.c.bf16 %v469_v29, %v469_v29  ;;  %v350_v42 = vmax.f32 %v202_v25, 1e-12  ;;  %v349_v16 = vmax.f32 %v199_v24, 1e-12 }
  0xbc   :  { %v1005_v17 = vpop.eup %1004  ;;  %791 = vst.msk [vmem:[%s1945_s1 + $0x34] sm:$0xf] %vm777_vm1, %v923_v36  ;;  %v472_v34 = vmul.f32 %v1003_v27, %v1225_v40 }
  0xbd   :  { %790 = vst.msk [vmem:[%s1945_s1 + $0x30] sm:$0xf] %vm777_vm1, %v922_v51  ;;  %v471_v35 = vmul.f32 %v1005_v17, %v1230_v41  ;;  %1014 = vrsqrt.f32 %v350_v42 }
  0xbe   :  { %v925_v55 = vpack.c.bf16 %v472_v34, %v472_v34  ;;  %1016 = vrsqrt.f32 %v349_v16  ;;  %v208_v43 = vpop.xlane.xlu1 %207  ;;  %v205_v2 = vpop.xlane.xlu0 %204 }
  0xbf   :  { %v1007_v6 = vpop.eup %1006  ;;  %v924_v54 = vpack.c.bf16 %v471_v35, %v471_v35  ;;  %v352_v37 = vmax.f32 %v208_v43, 1e-12  ;;  %v351_v50 = vmax.f32 %v205_v2, 1e-12 }
  0xc0   :  { %v1009_v62 = vpop.eup %1008  ;;  %793 = vst.msk [vmem:[%s1945_s1 + $0x3c] sm:$0xf] %vm777_vm1, %v925_v55  ;;  %v474_v40 = vmul.f32 %v1007_v6, %v1241_v46 }
  0xc1   :  { %792 = vst.msk [vmem:[%s1945_s1 + $0x38] sm:$0xf] %vm777_vm1, %v924_v54  ;;  %v473_v41 = vmul.f32 %v1009_v62, %v1246_v47  ;;  %1018 = vrsqrt.f32 %v352_v37 }
  0xc2   :  { %v927_v22 = vpack.c.bf16 %v474_v40, %v474_v40  ;;  %1020 = vrsqrt.f32 %v351_v50  ;;  %v214_v23 = vpop.xlane.xlu1 %213  ;;  %v211_v26 = vpop.xlane.xlu0 %210 }
  0xc3   :  { %v1011_v63 = vpop.eup %1010  ;;  %v926_v10 = vpack.c.bf16 %v473_v41, %v473_v41  ;;  %v354_v11 = vmax.f32 %v214_v23, 1e-12  ;;  %v353_v8 = vmax.f32 %v211_v26, 1e-12 }
  0xc4   :  { %v1013_v9 = vpop.eup %1012  ;;  %795 = vst.msk [vmem:[%s1945_s1 + $0x44] sm:$0xf] %vm777_vm1, %v927_v22  ;;  %v476_v46 = vmul.f32 %v1011_v63, %v1257_v52 }
  0xc5   :  { %794 = vst.msk [vmem:[%s1945_s1 + $0x40] sm:$0xf] %vm777_vm1, %v926_v10  ;;  %v475_v47 = vmul.f32 %v1013_v9, %v1262_v53  ;;  %1022 = vrsqrt.f32 %v354_v11 }
  0xc6   :  { %v929_v0 = vpack.c.bf16 %v476_v46, %v476_v46  ;;  %1024 = vrsqrt.f32 %v353_v8  ;;  %v220_v1 = vpop.xlane.xlu1 %219  ;;  %v217_v28 = vpop.xlane.xlu0 %216 }
  0xc7   :  { %v1015_v29 = vpop.eup %1014  ;;  %v928_v36 = vpack.c.bf16 %v475_v47, %v475_v47  ;;  %v356_v25 = vmax.f32 %v220_v1, 1e-12  ;;  %v355_v24 = vmax.f32 %v217_v28, 1e-12 }
  0xc8   :  { %v1017_v27 = vpop.eup %1016  ;;  %797 = vst.msk [vmem:[%s1945_s1 + $0x4c] sm:$0xf] %vm777_vm1, %v929_v0  ;;  %v478_v52 = vmul.f32 %v1015_v29, %v1273_v58 }
  0xc9   :  { %796 = vst.msk [vmem:[%s1945_s1 + $0x48] sm:$0xf] %vm777_vm1, %v928_v36  ;;  %v477_v53 = vmul.f32 %v1017_v27, %v1278_v59  ;;  %1026 = vrsqrt.f32 %v356_v25 }
  0xca   :  { %v931_v51 = vpack.c.bf16 %v478_v52, %v478_v52  ;;  %1028 = vrsqrt.f32 %v355_v24  ;;  %v226_v42 = vpop.xlane.xlu1 %225  ;;  %v223_v16 = vpop.xlane.xlu0 %222 }
  0xcb   :  { %v1019_v17 = vpop.eup %1018  ;;  %v930_v34 = vpack.c.bf16 %v477_v53, %v477_v53  ;;  %v358_v35 = vmax.f32 %v226_v42, 1e-12  ;;  %v357_v55 = vmax.f32 %v223_v16, 1e-12 }
  0xcc   :  { %v1021_v43 = vpop.eup %1020  ;;  %799 = vst.msk [vmem:[%s1945_s1 + $0x54] sm:$0xf] %vm777_vm1, %v931_v51  ;;  %v480_v58 = vmul.f32 %v1019_v17, %v1289_v3 }
  0xcd   :  { %798 = vst.msk [vmem:[%s1945_s1 + $0x50] sm:$0xf] %vm777_vm1, %v930_v34  ;;  %v479_v59 = vmul.f32 %v1021_v43, %v1294_v4  ;;  %1030 = vrsqrt.f32 %v358_v35 }
  0xce   :  { %v933_v2 = vpack.c.bf16 %v480_v58, %v480_v58  ;;  %1032 = vrsqrt.f32 %v357_v55  ;;  %v232_v6 = vpop.xlane.xlu1 %231  ;;  %v229_v54 = vpop.xlane.xlu0 %228 }
  0xcf   :  { %v1023_v37 = vpop.eup %1022  ;;  %v932_v50 = vpack.c.bf16 %v479_v59, %v479_v59  ;;  %v360_v62 = vmax.f32 %v232_v6, 1e-12  ;;  %v359_v40 = vmax.f32 %v229_v54, 1e-12 }
  0xd0   :  { %v1025_v41 = vpop.eup %1024  ;;  %801 = vst.msk [vmem:[%s1945_s1 + $0x5c] sm:$0xf] %vm777_vm1, %v933_v2  ;;  %v482_v3 = vmul.f32 %v1023_v37, %v1305_v12 }
  0xd1   :  { %800 = vst.msk [vmem:[%s1945_s1 + $0x58] sm:$0xf] %vm777_vm1, %v932_v50  ;;  %v481_v4 = vmul.f32 %v1025_v41, %v1310_v13  ;;  %1034 = vrsqrt.f32 %v360_v62 }
  0xd2   :  { %v935_v22 = vpack.c.bf16 %v482_v3, %v482_v3  ;;  %1036 = vrsqrt.f32 %v359_v40  ;;  %v238_v23 = vpop.xlane.xlu1 %237  ;;  %v235_v26 = vpop.xlane.xlu0 %234 }
  0xd3   :  { %v1027_v63 = vpop.eup %1026  ;;  %v934_v10 = vpack.c.bf16 %v481_v4, %v481_v4  ;;  %v362_v11 = vmax.f32 %v238_v23, 1e-12  ;;  %v361_v8 = vmax.f32 %v235_v26, 1e-12 }
  0xd4   :  { %v1029_v9 = vpop.eup %1028  ;;  %803 = vst.msk [vmem:[%s1945_s1 + $0x64] sm:$0xf] %vm777_vm1, %v935_v22  ;;  %v484_v12 = vmul.f32 %v1027_v63, %v1321_v20 }
  0xd5   :  { %802 = vst.msk [vmem:[%s1945_s1 + $0x60] sm:$0xf] %vm777_vm1, %v934_v10  ;;  %v483_v13 = vmul.f32 %v1029_v9, %v1326_v21  ;;  %1038 = vrsqrt.f32 %v362_v11 }
  0xd6   :  { %v937_v46 = vpack.c.bf16 %v484_v12, %v484_v12  ;;  %1040 = vrsqrt.f32 %v361_v8  ;;  %v244_v47 = vpop.xlane.xlu1 %243  ;;  %v241_v0 = vpop.xlane.xlu0 %240 }
  0xd7   :  { %v1031_v1 = vpop.eup %1030  ;;  %v936_v28 = vpack.c.bf16 %v483_v13, %v483_v13  ;;  %v364_v29 = vmax.f32 %v244_v47, 1e-12  ;;  %v363_v36 = vmax.f32 %v241_v0, 1e-12 }
  0xd8   :  { %v1033_v25 = vpop.eup %1032  ;;  %805 = vst.msk [vmem:[%s1945_s1 + $0x6c] sm:$0xf] %vm777_vm1, %v937_v46  ;;  %v486_v20 = vmul.f32 %v1031_v1, %v1337_v30 }
  0xd9   :  { %804 = vst.msk [vmem:[%s1945_s1 + $0x68] sm:$0xf] %vm777_vm1, %v936_v28  ;;  %v485_v21 = vmul.f32 %v1033_v25, %v1342_v31  ;;  %1042 = vrsqrt.f32 %v364_v29 }
  0xda   :  { %v939_v24 = vpack.c.bf16 %v486_v20, %v486_v20  ;;  %1044 = vrsqrt.f32 %v363_v36  ;;  %v250_v27 = vpop.xlane.xlu1 %249  ;;  %v247_v52 = vpop.xlane.xlu0 %246 }
  0xdb   :  { %v1035_v53 = vpop.eup %1034  ;;  %v938_v51 = vpack.c.bf16 %v485_v21, %v485_v21  ;;  %v366_v42 = vmax.f32 %v250_v27, 1e-12  ;;  %v365_v16 = vmax.f32 %v247_v52, 1e-12 }
  0xdc   :  { %v1037_v17 = vpop.eup %1036  ;;  %807 = vst.msk [vmem:[%s1945_s1 + $0x74] sm:$0xf] %vm777_vm1, %v939_v24  ;;  %v488_v30 = vmul.f32 %v1035_v53, %v1353_v38 }
  0xdd   :  { %806 = vst.msk [vmem:[%s1945_s1 + $0x70] sm:$0xf] %vm777_vm1, %v938_v51  ;;  %v487_v31 = vmul.f32 %v1037_v17, %v1358_v39  ;;  %1046 = vrsqrt.f32 %v366_v42 }
  0xde   :  { %v941_v34 = vpack.c.bf16 %v488_v30, %v488_v30  ;;  %1048 = vrsqrt.f32 %v365_v16  ;;  %v256_v35 = vpop.xlane.xlu1 %255  ;;  %v253_v55 = vpop.xlane.xlu0 %252 }
  0xdf   :  { %v1039_v43 = vpop.eup %1038  ;;  %v940_v58 = vpack.c.bf16 %v487_v31, %v487_v31  ;;  %v368_v59 = vmax.f32 %v256_v35, 1e-12  ;;  %v367_v2 = vmax.f32 %v253_v55, 1e-12 }
  0xe0   :  { %v1041_v6 = vpop.eup %1040  ;;  %809 = vst.msk [vmem:[%s1945_s1 + $0x7c] sm:$0xf] %vm777_vm1, %v941_v34  ;;  %v490_v38 = vmul.f32 %v1039_v43, %v1369_v48 }
  0xe1   :  { %808 = vst.msk [vmem:[%s1945_s1 + $0x78] sm:$0xf] %vm777_vm1, %v940_v58  ;;  %v489_v39 = vmul.f32 %v1041_v6, %v1374_v49  ;;  %1050 = vrsqrt.f32 %v368_v59 }
  0xe2   :  { %v943_v54 = vpack.c.bf16 %v490_v38, %v490_v38  ;;  %1052 = vrsqrt.f32 %v367_v2  ;;  %v262_v37 = vpop.xlane.xlu1 %261  ;;  %v259_v50 = vpop.xlane.xlu0 %258 }
  0xe3   :  { %v1043_v62 = vpop.eup %1042  ;;  %v942_v40 = vpack.c.bf16 %v489_v39, %v489_v39  ;;  %v370_v41 = vmax.f32 %v262_v37, 1e-12  ;;  %v369_v3 = vmax.f32 %v259_v50, 1e-12 }
  0xe4   :  { %v1045_v4 = vpop.eup %1044  ;;  %811 = vst.msk [vmem:[%s1945_s1 + $0x84] sm:$0xf] %vm777_vm1, %v943_v54  ;;  %v492_v48 = vmul.f32 %v1043_v62, %v1385_v56 }
  0xe5   :  { %810 = vst.msk [vmem:[%s1945_s1 + $0x80] sm:$0xf] %vm777_vm1, %v942_v40  ;;  %v491_v49 = vmul.f32 %v1045_v4, %v1390_v57  ;;  %1054 = vrsqrt.f32 %v370_v41 }
  0xe6   :  { %v945_v22 = vpack.c.bf16 %v492_v48, %v492_v48  ;;  %1056 = vrsqrt.f32 %v369_v3  ;;  %v268_v23 = vpop.xlane.xlu1 %267  ;;  %v265_v26 = vpop.xlane.xlu0 %264 }
  0xe7   :  { %v1047_v63 = vpop.eup %1046  ;;  %v944_v10 = vpack.c.bf16 %v491_v49, %v491_v49  ;;  %v372_v11 = vmax.f32 %v268_v23, 1e-12  ;;  %v371_v8 = vmax.f32 %v265_v26, 1e-12 }
  0xe8   :  { %v1049_v9 = vpop.eup %1048  ;;  %813 = vst.msk [vmem:[%s1945_s1 + $0x8c] sm:$0xf] %vm777_vm1, %v945_v22  ;;  %v494_v56 = vmul.f32 %v1047_v63, %v1401_v5 }
  0xe9   :  { %812 = vst.msk [vmem:[%s1945_s1 + $0x88] sm:$0xf] %vm777_vm1, %v944_v10  ;;  %v493_v57 = vmul.f32 %v1049_v9, %v1406_v7  ;;  %1058 = vrsqrt.f32 %v372_v11 }
  0xea   :  { %v947_v12 = vpack.c.bf16 %v494_v56, %v494_v56  ;;  %1060 = vrsqrt.f32 %v371_v8  ;;  %v274_v13 = vpop.xlane.xlu1 %273  ;;  %v271_v46 = vpop.xlane.xlu0 %270 }
  0xeb   :  { %v1051_v47 = vpop.eup %1050  ;;  %v946_v0 = vpack.c.bf16 %v493_v57, %v493_v57  ;;  %v374_v1 = vmax.f32 %v274_v13, 1e-12  ;;  %v373_v28 = vmax.f32 %v271_v46, 1e-12 }
  0xec   :  { %v1053_v29 = vpop.eup %1052  ;;  %815 = vst.msk [vmem:[%s1945_s1 + $0x94] sm:$0xf] %vm777_vm1, %v947_v12  ;;  %v496_v5 = vmul.f32 %v1051_v47, %v1417_v18 }
  0xed   :  { %814 = vst.msk [vmem:[%s1945_s1 + $0x90] sm:$0xf] %vm777_vm1, %v946_v0  ;;  %v495_v7 = vmul.f32 %v1053_v29, %v1422_v19  ;;  %1062 = vrsqrt.f32 %v374_v1 }
  0xee   :  { %v949_v36 = vpack.c.bf16 %v496_v5, %v496_v5  ;;  %1064 = vrsqrt.f32 %v373_v28  ;;  %v280_v25 = vpop.xlane.xlu1 %279  ;;  %v277_v20 = vpop.xlane.xlu0 %276  ;;  %v1980_v28 = vld [vmem:[#allocation4_spill] sm:$0xff]  ;;  %v1981_v5 = vld [vmem:[#allocation5_spill] sm:$0xff] }
  0xef   :  { %v1055_v21 = vpop.eup %1054  ;;  %v948_v24 = vpack.c.bf16 %v495_v7, %v495_v7  ;;  %v376_v27 = vmax.f32 %v280_v25, 1e-12  ;;  %v375_v52 = vmax.f32 %v277_v20, 1e-12 }
  0xf0   :  { %v1057_v53 = vpop.eup %1056  ;;  %817 = vst.msk [vmem:[%s1945_s1 + $0x9c] sm:$0xf] %vm777_vm1, %v949_v36  ;;  %v498_v18 = vmul.f32 %v1055_v21, %v1433_v32 }
  0xf1   :  { %816 = vst.msk [vmem:[%s1945_s1 + $0x98] sm:$0xf] %vm777_vm1, %v948_v24  ;;  %v497_v19 = vmul.f32 %v1057_v53, %v1438_v33  ;;  %1066 = vrsqrt.f32 %v376_v27 }
  0xf2   :  { %v951_v51 = vpack.c.bf16 %v498_v18, %v498_v18  ;;  %1068 = vrsqrt.f32 %v375_v52  ;;  %v286_v42 = vpop.xlane.xlu1 %285  ;;  %v283_v16 = vpop.xlane.xlu0 %282  ;;  %v1982_v18 = vld [vmem:[#allocation6_spill] sm:$0xff] }
  0xf3   :  { %v1059_v17 = vpop.eup %1058  ;;  %v950_v30 = vpack.c.bf16 %v497_v19, %v497_v19  ;;  %v378_v31 = vmax.f32 %v286_v42, 1e-12  ;;  %v377_v34 = vmax.f32 %v283_v16, 1e-12 }
  0xf4   :  { %v1061_v35 = vpop.eup %1060  ;;  %819 = vst.msk [vmem:[%s1945_s1 + $0xa4] sm:$0xf] %vm777_vm1, %v951_v51  ;;  %v500_v32 = vmul.f32 %v1059_v17, %v1449_v44  ;;  %v1983_v51 = vld [vmem:[#allocation7_spill] sm:$0xff] }
  0xf5   :  { %818 = vst.msk [vmem:[%s1945_s1 + $0xa0] sm:$0xf] %vm777_vm1, %v950_v30  ;;  %v499_v33 = vmul.f32 %v1061_v35, %v1454_v45  ;;  %1070 = vrsqrt.f32 %v378_v31 }
  0xf6   :  { %v953_v55 = vpack.c.bf16 %v500_v32, %v500_v32  ;;  %1072 = vrsqrt.f32 %v377_v34  ;;  %v292_v43 = vpop.xlane.xlu1 %291  ;;  %v289_v58 = vpop.xlane.xlu0 %288 }
  0xf7   :  { %v1063_v59 = vpop.eup %1062  ;;  %v952_v2 = vpack.c.bf16 %v499_v33, %v499_v33  ;;  %v380_v6 = vmax.f32 %v292_v43, 1e-12  ;;  %v379_v38 = vmax.f32 %v289_v58, 1e-12  ;;  %v1985_v58 = vld [vmem:[#allocation9_spill] sm:$0xff] }
  0xf8   :  { %v1065_v39 = vpop.eup %1064  ;;  %821 = vst.msk [vmem:[%s1945_s1 + $0xac] sm:$0xf] %vm777_vm1, %v953_v55  ;;  %v502_v44 = vmul.f32 %v1063_v59, %v1465_v60  ;;  %v1984_v55 = vld [vmem:[#allocation8_spill] sm:$0xff] }
  0xf9   :  { %820 = vst.msk [vmem:[%s1945_s1 + $0xa8] sm:$0xf] %vm777_vm1, %v952_v2  ;;  %v501_v45 = vmul.f32 %v1065_v39, %v1470_v61  ;;  %1074 = vrsqrt.f32 %v380_v6 }
  0xfa   :  { %v955_v54 = vpack.c.bf16 %v502_v44, %v502_v44  ;;  %1076 = vrsqrt.f32 %v379_v38  ;;  %v298_v37 = vpop.xlane.xlu1 %297  ;;  %v295_v50 = vpop.xlane.xlu0 %294 }
  0xfb   :  { %v1067_v62 = vpop.eup %1066  ;;  %v954_v40 = vpack.c.bf16 %v501_v45, %v501_v45  ;;  %v382_v41 = vmax.f32 %v298_v37, 1e-12  ;;  %v381_v3 = vmax.f32 %v295_v50, 1e-12  ;;  %v1986_v50 = vld [vmem:[#allocation10_spill] sm:$0xff] }
  0xfc   :  { %v1069_v4 = vpop.eup %1068  ;;  %823 = vst.msk [vmem:[%s1945_s1 + $0xb4] sm:$0xf] %vm777_vm1, %v955_v54  ;;  %v504_v60 = vmul.f32 %v1067_v62, %v1481_v14  ;;  %v1978_v14 = vld [vmem:[#allocation2_spill] sm:$0xff] }
  0xfd   :  { %822 = vst.msk [vmem:[%s1945_s1 + $0xb0] sm:$0xf] %vm777_vm1, %v954_v40  ;;  %v503_v61 = vmul.f32 %v1069_v4, %v1486_v15  ;;  %1078 = vrsqrt.f32 %v382_v41  ;;  %v1979_v15 = vld [vmem:[#allocation3_spill] sm:$0xff] }
  0xfe   :  { %v957_v48 = vpack.c.bf16 %v504_v60, %v504_v60  ;;  %1080 = vrsqrt.f32 %v381_v3  ;;  %v304_v49 = vpop.xlane.xlu1 %303  ;;  %v301_v22 = vpop.xlane.xlu0 %300  ;;  %v1987_v40 = vld [vmem:[#allocation11_spill] sm:$0xff] }
  0xff   :  { %v1071_v23 = vpop.eup %1070  ;;  %v956_v26 = vpack.c.bf16 %v503_v61, %v503_v61  ;;  %v384_v63 = vmax.f32 %v304_v49, 1e-12  ;;  %v383_v10 = vmax.f32 %v301_v22, 1e-12  ;;  %v1989_v22 = vld [vmem:[#allocation13_spill] sm:$0xff] }
 0x100   :  { %v1073_v11 = vpop.eup %1072  ;;  %825 = vst.msk [vmem:[%s1945_s1 + $0xbc] sm:$0xf] %vm777_vm1, %v957_v48  ;;  %v506_v8 = vmul.f32 %v1071_v23, %v1978_v14  ;;  %v1988_v48 = vld [vmem:[#allocation12_spill] sm:$0xff]  ;;  %v1990_v14 = vld [vmem:[#allocation14_spill] sm:$0xff] }
 0x101   :  { %824 = vst.msk [vmem:[%s1945_s1 + $0xb8] sm:$0xf] %vm777_vm1, %v956_v26  ;;  %v505_v9 = vmul.f32 %v1073_v11, %v1979_v15  ;;  %1082 = vrsqrt.f32 %v384_v63  ;;  %v1991_v15 = vld [vmem:[#allocation15_spill] sm:$0xff] }
 0x102   :  { %v959_v56 = vpack.c.bf16 %v506_v8, %v506_v8  ;;  %1084 = vrsqrt.f32 %v383_v10  ;;  %v310_v57 = vpop.xlane.xlu1 %309  ;;  %v307_v12 = vpop.xlane.xlu0 %306 }
 0x103   :  { %v1075_v13 = vpop.eup %1074  ;;  %v958_v46 = vpack.c.bf16 %v505_v9, %v505_v9  ;;  %v386_v47 = vmax.f32 %v310_v57, 1e-12  ;;  %v385_v0 = vmax.f32 %v307_v12, 1e-12 }
 0x104   :  { %v1077_v1 = vpop.eup %1076  ;;  %827 = vst.msk [vmem:[%s1945_s1 + $0xc4] sm:$0xf] %vm777_vm1, %v959_v56  ;;  %v508_v29 = vmul.f32 %v1075_v13, %v1980_v28 }
 0x105   :  { %826 = vst.msk [vmem:[%s1945_s1 + $0xc0] sm:$0xf] %vm777_vm1, %v958_v46  ;;  %v507_v7 = vmul.f32 %v1077_v1, %v1981_v5  ;;  %1086 = vrsqrt.f32 %v386_v47  ;;  %v1992_v46 = vld [vmem:[#allocation16_spill] sm:$0xff] }
 0x106   :  { %v961_v36 = vpack.c.bf16 %v508_v29, %v508_v29  ;;  %1088 = vrsqrt.f32 %v385_v0  ;;  %v316_v25 = vpop.xlane.xlu1 %315  ;;  %v313_v20 = vpop.xlane.xlu0 %312  ;;  %v1993_v0 = vld [vmem:[#allocation17_spill] sm:$0xff] }
 0x107   :  { %v1079_v21 = vpop.eup %1078  ;;  %v960_v24 = vpack.c.bf16 %v507_v7, %v507_v7  ;;  %v388_v27 = vmax.f32 %v316_v25, 1e-12  ;;  %v387_v52 = vmax.f32 %v313_v20, 1e-12 }
 0x108   :  { %v1081_v53 = vpop.eup %1080  ;;  %829 = vst.msk [vmem:[%s1945_s1 + $0xcc] sm:$0xf] %vm777_vm1, %v961_v36  ;;  %v510_v19 = vmul.f32 %v1079_v21, %v1982_v18 }
 0x109   :  { %828 = vst.msk [vmem:[%s1945_s1 + $0xc8] sm:$0xf] %vm777_vm1, %v960_v24  ;;  %v509_v42 = vmul.f32 %v1081_v53, %v1983_v51  ;;  %1090 = vrsqrt.f32 %v388_v27 }
 0x10a   :  { %v963_v16 = vpack.c.bf16 %v510_v19, %v510_v19  ;;  %1092 = vrsqrt.f32 %v387_v52  ;;  %v322_v17 = vpop.xlane.xlu1 %321  ;;  %v319_v30 = vpop.xlane.xlu0 %318 }
 0x10b   :  { %v1083_v31 = vpop.eup %1082  ;;  %v962_v34 = vpack.c.bf16 %v509_v42, %v509_v42  ;;  %v390_v35 = vmax.f32 %v322_v17, 1e-12  ;;  %v389_v32 = vmax.f32 %v319_v30, 1e-12 }
 0x10c   :  { %v1085_v33 = vpop.eup %1084  ;;  %831 = vst.msk [vmem:[%s1945_s1 + $0xd4] sm:$0xf] %vm777_vm1, %v963_v16  ;;  %v512_v43 = vmul.f32 %v1083_v31, %v1984_v55 }
 0x10d   :  { %830 = vst.msk [vmem:[%s1945_s1 + $0xd0] sm:$0xf] %vm777_vm1, %v962_v34  ;;  %v511_v59 = vmul.f32 %v1085_v33, %v1985_v58  ;;  %1094 = vrsqrt.f32 %v390_v35 }
 0x10e   :  { %v965_v2 = vpack.c.bf16 %v512_v43, %v512_v43  ;;  %1096 = vrsqrt.f32 %v389_v32  ;;  %v328_v6 = vpop.xlane.xlu1 %327  ;;  %v325_v38 = vpop.xlane.xlu0 %324 }
 0x10f   :  { %v1087_v39 = vpop.eup %1086  ;;  %v964_v44 = vpack.c.bf16 %v511_v59, %v511_v59  ;;  %v392_v45 = vmax.f32 %v328_v6, 1e-12  ;;  %v391_v54 = vmax.f32 %v325_v38, 1e-12 }
 0x110   :  { %v1089_v37 = vpop.eup %1088  ;;  %833 = vst.msk [vmem:[%s1945_s1 + $0xdc] sm:$0xf] %vm777_vm1, %v965_v2  ;;  %v514_v62 = vmul.f32 %v1087_v39, %v1986_v50 }
 0x111   :  { %832 = vst.msk [vmem:[%s1945_s1 + $0xd8] sm:$0xf] %vm777_vm1, %v964_v44  ;;  %v513_v41 = vmul.f32 %v1089_v37, %v1987_v40  ;;  %1098 = vrsqrt.f32 %v392_v45 }
 0x112   :  { %v967_v3 = vpack.c.bf16 %v514_v62, %v514_v62  ;;  %1100 = vrsqrt.f32 %v391_v54 }
 0x113   :  { %v1091_v4 = vpop.eup %1090  ;;  %v966_v60 = vpack.c.bf16 %v513_v41, %v513_v41 }
 0x114   :  { %v1093_v61 = vpop.eup %1092  ;;  %835 = vst.msk [vmem:[%s1945_s1 + $0xe4] sm:$0xf] %vm777_vm1, %v967_v3  ;;  %v516_v49 = vmul.f32 %v1091_v4, %v1988_v48 }
 0x115   :  { %834 = vst.msk [vmem:[%s1945_s1 + $0xe0] sm:$0xf] %vm777_vm1, %v966_v60  ;;  %v515_v23 = vmul.f32 %v1093_v61, %v1989_v22 }
 0x116   :  { %v969_v26 = vpack.c.bf16 %v516_v49, %v516_v49 }
 0x117   :  { %v1095_v63 = vpop.eup %1094  ;;  %v968_v10 = vpack.c.bf16 %v515_v23, %v515_v23 }
 0x118   :  { %v1097_v11 = vpop.eup %1096  ;;  %837 = vst.msk [vmem:[%s1945_s1 + $0xec] sm:$0xf] %vm777_vm1, %v969_v26  ;;  %v518_v8 = vmul.f32 %v1095_v63, %v1990_v14 }
 0x119   :  { %836 = vst.msk [vmem:[%s1945_s1 + $0xe8] sm:$0xf] %vm777_vm1, %v968_v10  ;;  %v517_v9 = vmul.f32 %v1097_v11, %v1991_v15 }
 0x11a   :  { %v971_v56 = vpack.c.bf16 %v518_v8, %v518_v8 }
 0x11b   :  { %v1099_v57 = vpop.eup %1098  ;;  %v970_v12 = vpack.c.bf16 %v517_v9, %v517_v9 }
 0x11c   :  { %v1101_v13 = vpop.eup %1100  ;;  %839 = vst.msk [vmem:[%s1945_s1 + $0xf4] sm:$0xf] %vm777_vm1, %v971_v56  ;;  %v520_v47 = vmul.f32 %v1099_v57, %v1992_v46 }
 0x11d   :  { %838 = vst.msk [vmem:[%s1945_s1 + $0xf0] sm:$0xf] %vm777_vm1, %v970_v12  ;;  %v519_v1 = vmul.f32 %v1101_v13, %v1993_v0 }
 0x11e   :  { %v973_v28 = vpack.c.bf16 %v520_v47, %v520_v47 }
 0x11f   :  { %v972_v29 = vpack.c.bf16 %v519_v1, %v519_v1 }
 0x120   :  { %841 = vst.msk [vmem:[%s1945_s1 + $0xfc] sm:$0xf] %vm777_vm1, %v973_v28 }
 0x121   :  { %840 = vst.msk [vmem:[%s1945_s1 + $0xf8] sm:$0xf] %vm777_vm1, %v972_v29 }

</bundles_post_ra>
